<compile_context>
chip_gen: v5e
topology: v5e:2x2
jax: 0.10.0
libtpu: 0.0.40
codegen_flags: <defaults>
</compile_context>

<pallas_src>
import jax
import jax.numpy as jnp
from jax.experimental import pallas as pl
from jax.experimental.pallas import tpu as pltpu

KSIZE = 7
PAD = KSIZE // 2


def _round_up(n, m):
    return (n + m - 1) // m * m


def _cbam_kernel(x_ref, w1t_ref, b1_ref, w2t_ref, b2_ref, t_ref, cb_ref, o_ref):
    f32 = jnp.float32
    TB = x_ref.shape[0]

    x = x_ref[...]                                           # (TB, C, HW), input dtype

    # ---------------- channel attention ----------------
    # f32 accumulation for the pools without materializing an f32 copy of x.
    avg = jnp.mean(x, axis=2, dtype=f32)                     # (TB, C)
    mx = jnp.max(x, axis=2).astype(f32)                      # (TB, C)
    pooled = jnp.concatenate([avg, mx], axis=0)              # (2*TB, C)

    # Shared tiny MLP as two MXU matmuls (hidden dim zero-padded to >= 8 in
    # the wrapper; padded lanes contribute exactly zero).
    h = jnp.dot(pooled, w1t_ref[...], preferred_element_type=f32) + b1_ref[...]
    h = jnp.maximum(h, 0.0)                                  # (2*TB, Crp)
    mlp = jnp.dot(h, w2t_ref[...], preferred_element_type=f32) + b2_ref[...]
    ca = jax.nn.sigmoid(mlp[:TB] + mlp[TB:])                 # (TB, C)

    x1 = x * ca[:, :, None].astype(x.dtype)                  # (TB, C, HW)

    # ---------------- spatial attention ----------------
    s_avg = jnp.mean(x1, axis=1, dtype=f32)                  # (TB, HW)
    s_max = jnp.max(x1, axis=1).astype(f32)                  # (TB, HW)
    maps = jnp.concatenate([s_avg, s_max], axis=-1)          # (TB, 2*HW), 128-aligned concat

    # 7x7 'same' conv as ONE MXU matmul against the precomputed Toeplitz
    # matrix (zero padding is baked in: out-of-image source pixels have no row).
    conv = jnp.dot(maps, t_ref[...], preferred_element_type=f32)   # (TB, HW)
    sa = jax.nn.sigmoid(conv + cb_ref[0])                    # (TB, HW)

    o_ref[...] = (x1 * sa[:, None, :].astype(x.dtype)).astype(o_ref.dtype)


def _pick_tb(B, per_sample_bytes, target_bytes, num_cores):
    """Largest divisor of B that fits the byte budget, preferring multiples of 8."""
    cap = max(1, target_bytes // max(per_sample_bytes, 1))
    divisors = [d for d in range(1, B + 1) if B % d == 0]
    fits = [d for d in divisors if d <= cap] or [1]
    mult8 = [d for d in fits if d % 8 == 0]
    tb = max(mult8) if mult8 else max(fits)
    # Only on 2-TensorCore chips (v7x): keep >= 2 grid steps so both cores get
    # work, but never drop below 8 samples per step to do it.
    if num_cores >= 2 and B // tb < 2:
        cands = [d for d in fits if B // d >= 2 and d >= 8]
        if cands:
            tb = max(cands)
    return tb


def cbam_pallas(x, params, *, target_block_bytes=None):
    B, C, H, W = x.shape
    HW = H * W
    f32 = jnp.float32

    # Generation-aware tiling / VMEM budget.
    kind = ""
    try:
        kind = jax.devices()[0].device_kind.lower()
    except Exception:
        pass
    is_v7x = "v7" in kind
    num_cores = 2 if is_v7x else 1
    if target_block_bytes is None:
        target_block_bytes = (4 << 20) if is_v7x else (8 << 20)
    vmem_limit_bytes = (48 << 20) if is_v7x else (64 << 20)

    # Lane-dense layout: last axis is H*W.
    x_r = x.reshape(B, C, HW)
    per_sample = C * HW * jnp.dtype(x.dtype).itemsize
    tb = _pick_tb(B, per_sample, target_block_bytes, num_cores)
    grid = (B // tb,)

    # ---- channel-MLP weights: transpose + zero-pad hidden dim to >= 8 ----
    Cr = params["fc1_w"].shape[0]
    Crp = max(8, _round_up(Cr, 8))
    w1t = jnp.zeros((C, Crp), f32).at[:, :Cr].set(params["fc1_w"].T.astype(f32))
    b1 = jnp.zeros((1, Crp), f32).at[0, :Cr].set(params["fc1_b"].astype(f32))
    w2t = jnp.zeros((Crp, C), f32).at[:Cr, :].set(params["fc2_w"].T.astype(f32))
    b2 = params["fc2_b"].reshape(1, C).astype(f32)
    cb = params["conv_b"].reshape(1).astype(f32)             # scalar -> SMEM

    # ---- 7x7 'same' conv as a (2*HW, HW) Toeplitz matrix ----
    # T[ci*HW + j, i] = w[0, ci, yj - yi + PAD, xj - xi + PAD] whenever source
    # pixel j lies inside the 7x7 window of output pixel i; zero padding falls
    # out automatically because out-of-image source pixels have no row.
    cw = params["conv_w"].reshape(2, KSIZE, KSIZE).astype(f32)
    pix = jnp.arange(HW)
    py, px = pix // W, pix % W
    dy = py[:, None] - py[None, :]                            # (HW src, HW dst)
    dx = px[:, None] - px[None, :]
    valid = (jnp.abs(dy) <= PAD) & (jnp.abs(dx) <= PAD)
    ky = jnp.clip(dy + PAD, 0, KSIZE - 1)
    kx = jnp.clip(dx + PAD, 0, KSIZE - 1)
    toep = jnp.concatenate(
        [jnp.where(valid, cw[ci][ky, kx], 0.0) for ci in range(2)], axis=0)  # (2*HW, HW)

    out = pl.pallas_call(
        _cbam_kernel,
        out_shape=jax.ShapeDtypeStruct((B, C, HW), x.dtype),
        grid=grid,
        in_specs=[
            pl.BlockSpec((tb, C, HW), lambda b: (b, 0, 0)),       # x (TB samples per step)
            pl.BlockSpec((C, Crp), lambda b: (0, 0)),             # fc1 weight^T (padded)
            pl.BlockSpec((1, Crp), lambda b: (0, 0)),             # fc1 bias (padded)
            pl.BlockSpec((Crp, C), lambda b: (0, 0)),             # fc2 weight^T (padded)
            pl.BlockSpec((1, C), lambda b: (0, 0)),               # fc2 bias
            pl.BlockSpec((2 * HW, HW), lambda b: (0, 0)),         # conv Toeplitz matrix
            pl.BlockSpec(memory_space=pltpu.MemorySpace.SMEM),    # conv bias (scalar)
        ],
        out_specs=pl.BlockSpec((tb, C, HW), lambda b: (b, 0, 0)),
        compiler_params=pltpu.CompilerParams(
            dimension_semantics=("parallel",),
            vmem_limit_bytes=vmem_limit_bytes,
        ),
    )(x_r, w1t, b1, w2t, b2, toep, cb)

    return out.reshape(B, C, H, W)


def cbam_reference(x, params):
    # Plain-JAX reference mirroring the PyTorch module, for validation.
    avg = jnp.mean(x, axis=(2, 3))           # (B, C)
    mx = jnp.max(x, axis=(2, 3))             # (B, C)

    def mlp(v):
        h = jnp.maximum(v @ params["fc1_w"].T + params["fc1_b"], 0.0)
        return h @ params["fc2_w"].T + params["fc2_b"]

    ca = jax.nn.sigmoid(mlp(avg) + mlp(mx))[:, :, None, None]
    x1 = x * ca
    s_avg = jnp.mean(x1, axis=1, keepdims=True)
    s_max = jnp.max(x1, axis=1, keepdims=True)
    s = jnp.concatenate([s_avg, s_max], axis=1)  # (B, 2, H, W)
    conv = jax.lax.conv_general_dilated(
        s, params["conv_w"], window_strides=(1, 1),
        padding=((PAD, PAD), (PAD, PAD)),
        dimension_numbers=("NCHW", "OIHW", "NCHW"))
    sa = jax.nn.sigmoid(conv + params["conv_b"][None, :, None, None])
    return x1 * sa


if __name__ == "__main__":
    # Module config: channels=32, reduction_ratio=16 -> hidden = 2
    B, C, H, W = 2, 32, 16, 16
    Cr = C // 16

    key = jax.random.PRNGKey(0)
    kx, k1, k2, k3, k4, k5, k6 = jax.random.split(key, 7)

    x = jax.random.normal(kx, (B, C, H, W), dtype=jnp.float32)
    params = {
        "fc1_w": 0.1 * jax.random.normal(k1, (Cr, C), dtype=jnp.float32),
        "fc1_b": 0.1 * jax.random.normal(k2, (Cr,), dtype=jnp.float32),
        "fc2_w": 0.1 * jax.random.normal(k3, (C, Cr), dtype=jnp.float32),
        "fc2_b": 0.1 * jax.random.normal(k4, (C,), dtype=jnp.float32),
        "conv_w": 0.1 * jax.random.normal(k5, (1, 2, KSIZE, KSIZE), dtype=jnp.float32),
        "conv_b": 0.1 * jax.random.normal(k6, (1,), dtype=jnp.float32),
    }

    out = jax.block_until_ready(cbam_pallas(x, params))
    ref = cbam_reference(x, params)

    assert out.shape == (B, C, H, W)
    err = jnp.max(jnp.abs(out - ref))
    # Tolerance deliberately left at 1e-3 to allow for MXU pass decomposition
    # of the f32 matmuls (observed error is far smaller).
    assert jnp.allclose(out, ref, atol=1e-3, rtol=1e-3), f"max abs err = {err}"

    print("KERNEL_OK")
</pallas_src>

<mosaic_0001>
module attributes {stable_mosaic.version = 11 : i64} {
  func.func @_cbam_kernel(%arg0: i32, %arg1: memref<2x32x256xf32, #tpu.memory_space<vmem>>, %arg2: memref<32x8xf32, #tpu.memory_space<vmem>>, %arg3: memref<1x8xf32, #tpu.memory_space<vmem>>, %arg4: memref<8x32xf32, #tpu.memory_space<vmem>>, %arg5: memref<1x32xf32, #tpu.memory_space<vmem>>, %arg6: memref<512x256xf32, #tpu.memory_space<vmem>>, %arg7: memref<1xf32, #tpu.memory_space<smem>>, %arg8: memref<2x32x256xf32, #tpu.memory_space<vmem>>) attributes {dimension_semantics = [#tpu.dimension_semantics<parallel>], iteration_bounds = array<i64: 1>, scalar_prefetch = 0 : i64, scratch_operands = 0 : i64, tpu.core_type = #tpu.core_type<tc>, window_params = [{transform_indices = @transform_0, window_bounds = array<i64: 2, 32, 256>}, {pipeline_mode = #tpu.pipeline_mode<synchronous>, transform_indices = @transform_1, window_bounds = array<i64: 32, 8>}, {pipeline_mode = #tpu.pipeline_mode<synchronous>, transform_indices = @transform_2, window_bounds = array<i64: 1, 8>}, {pipeline_mode = #tpu.pipeline_mode<synchronous>, transform_indices = @transform_3, window_bounds = array<i64: 8, 32>}, {pipeline_mode = #tpu.pipeline_mode<synchronous>, transform_indices = @transform_4, window_bounds = array<i64: 1, 32>}, {pipeline_mode = #tpu.pipeline_mode<synchronous>, transform_indices = @transform_5, window_bounds = array<i64: 512, 256>}, {transform_indices = @transform_6, window_bounds = array<i64: 1>}, {transform_indices = @transform_7, window_bounds = array<i64: 2, 32, 256>}]} {
    %c0 = arith.constant 0 : index
    %c0_0 = arith.constant 0 : index
    %c0_1 = arith.constant 0 : index
    %0 = vector.load %arg1[%c0, %c0_0, %c0_1] : memref<2x32x256xf32, #tpu.memory_space<vmem>>, vector<2x32x256xf32>
    %cst = arith.constant dense<0.000000e+00> : vector<2x32xf32>
    %1 = vector.multi_reduction <add>, %0, %cst [2] : vector<2x32x256xf32> to vector<2x32xf32>
    %cst_2 = arith.constant 2.560000e+02 : f32
    %2 = vector.broadcast %cst_2 : f32 to vector<2x32xf32>
    %3 = arith.divf %1, %2 : vector<2x32xf32>
    %cst_3 = arith.constant dense<0xFF800000> : vector<2x32xf32>
    %4 = vector.multi_reduction <maximumf>, %0, %cst_3 [2] : vector<2x32x256xf32> to vector<2x32xf32>
    %5 = tpu.concatenate %3, %4 in 0 : vector<2x32xf32>, vector<2x32xf32> -> vector<4x32xf32>
    %c0_4 = arith.constant 0 : index
    %c0_5 = arith.constant 0 : index
    %6 = vector.load %arg2[%c0_4, %c0_5] : memref<32x8xf32, #tpu.memory_space<vmem>>, vector<32x8xf32>
    %cst_6 = arith.constant dense<0.000000e+00> : vector<4x8xf32>
    %7 = tpu.matmul %5, %6, %cst_6 {dimension_numbers = #tpu.dot_dimension_numbers<[1], [0], [0], [1], [0, 0, 1, 1], [], []>} : vector<4x32xf32>, vector<32x8xf32>, vector<4x8xf32> -> vector<4x8xf32>
    %c0_7 = arith.constant 0 : index
    %c0_8 = arith.constant 0 : index
    %8 = vector.load %arg3[%c0_7, %c0_8] : memref<1x8xf32, #tpu.memory_space<vmem>>, vector<1x8xf32>
    %9 = vector.broadcast %8 : vector<1x8xf32> to vector<4x8xf32>
    %10 = arith.addf %7, %9 : vector<4x8xf32>
    %cst_9 = arith.constant 0.000000e+00 : f32
    %11 = vector.broadcast %cst_9 : f32 to vector<4x8xf32>
    %12 = arith.maximumf %10, %11 : vector<4x8xf32>
    %c0_10 = arith.constant 0 : index
    %c0_11 = arith.constant 0 : index
    %13 = vector.load %arg4[%c0_10, %c0_11] : memref<8x32xf32, #tpu.memory_space<vmem>>, vector<8x32xf32>
    %cst_12 = arith.constant dense<0.000000e+00> : vector<4x32xf32>
    %14 = tpu.matmul %12, %13, %cst_12 {dimension_numbers = #tpu.dot_dimension_numbers<[1], [0], [0], [1], [0, 0, 1, 1], [], []>} : vector<4x8xf32>, vector<8x32xf32>, vector<4x32xf32> -> vector<4x32xf32>
    %c0_13 = arith.constant 0 : index
    %c0_14 = arith.constant 0 : index
    %15 = vector.load %arg5[%c0_13, %c0_14] : memref<1x32xf32, #tpu.memory_space<vmem>>, vector<1x32xf32>
    %16 = vector.broadcast %15 : vector<1x32xf32> to vector<4x32xf32>
    %17 = arith.addf %14, %16 : vector<4x32xf32>
    %18 = vector.extract_strided_slice %17 {offsets = [0, 0], sizes = [2, 32], strides = [1, 1]} : vector<4x32xf32> to vector<2x32xf32>
    %19 = vector.extract_strided_slice %17 {offsets = [2, 0], sizes = [2, 32], strides = [1, 1]} : vector<4x32xf32> to vector<2x32xf32>
    %20 = arith.addf %18, %19 : vector<2x32xf32>
    %21 = arith.negf %20 : vector<2x32xf32>
    %22 = math.exp %21 : vector<2x32xf32>
    %cst_15 = arith.constant 1.000000e+00 : f32
    %23 = vector.broadcast %cst_15 : f32 to vector<2x32xf32>
    %24 = arith.addf %23, %22 : vector<2x32xf32>
    %25 = arith.divf %23, %24 : vector<2x32xf32>
    %26 = vector.shape_cast %25 : vector<2x32xf32> to vector<2x32x1xf32>
    %27 = vector.broadcast %26 : vector<2x32x1xf32> to vector<2x32x256xf32>
    %28 = arith.mulf %0, %27 : vector<2x32x256xf32>
    %cst_16 = arith.constant dense<0.000000e+00> : vector<2x256xf32>
    %29 = vector.multi_reduction <add>, %28, %cst_16 [1] : vector<2x32x256xf32> to vector<2x256xf32>
    %cst_17 = arith.constant 3.200000e+01 : f32
    %30 = vector.broadcast %cst_17 : f32 to vector<2x256xf32>
    %31 = arith.divf %29, %30 : vector<2x256xf32>
    %cst_18 = arith.constant dense<0xFF800000> : vector<2x256xf32>
    %32 = vector.multi_reduction <maximumf>, %28, %cst_18 [1] : vector<2x32x256xf32> to vector<2x256xf32>
    %33 = tpu.concatenate %31, %32 in 1 : vector<2x256xf32>, vector<2x256xf32> -> vector<2x512xf32>
    %c0_19 = arith.constant 0 : index
    %c0_20 = arith.constant 0 : index
    %34 = vector.load %arg6[%c0_19, %c0_20] : memref<512x256xf32, #tpu.memory_space<vmem>>, vector<512x256xf32>
    %cst_21 = arith.constant dense<0.000000e+00> : vector<2x256xf32>
    %35 = tpu.matmul %33, %34, %cst_21 {dimension_numbers = #tpu.dot_dimension_numbers<[1], [0], [0], [1], [0, 0, 1, 1], [], []>} : vector<2x512xf32>, vector<512x256xf32>, vector<2x256xf32> -> vector<2x256xf32>
    %c0_22 = arith.constant 0 : index
    %36 = memref.load %arg7[%c0_22] : memref<1xf32, #tpu.memory_space<smem>>
    %37 = vector.broadcast %36 : f32 to vector<2x256xf32>
    %38 = arith.addf %35, %37 : vector<2x256xf32>
    %39 = arith.negf %38 : vector<2x256xf32>
    %40 = math.exp %39 : vector<2x256xf32>
    %cst_23 = arith.constant 1.000000e+00 : f32
    %41 = vector.broadcast %cst_23 : f32 to vector<2x256xf32>
    %42 = arith.addf %41, %40 : vector<2x256xf32>
    %43 = arith.divf %41, %42 : vector<2x256xf32>
    %44 = vector.shape_cast %43 : vector<2x256xf32> to vector<2x1x256xf32>
    %45 = vector.broadcast %44 : vector<2x1x256xf32> to vector<2x32x256xf32>
    %46 = arith.mulf %28, %45 : vector<2x32x256xf32>
    %c0_24 = arith.constant 0 : index
    %c0_25 = arith.constant 0 : index
    %c0_26 = arith.constant 0 : index
    %47 = vector.load %arg8[%c0_24, %c0_25, %c0_26] : memref<2x32x256xf32, #tpu.memory_space<vmem>>, vector<2x32x256xf32>
    tpu.vector_store %arg8[%c0_24, %c0_25, %c0_26], %46 {strides = array<i32>} : memref<2x32x256xf32, #tpu.memory_space<vmem>>, vector<2x32x256xf32>,
    return
  }
  func.func @transform_0(%arg0: i32) -> (i32, i32, i32) {
    %c0_i32 = arith.constant 0 : i32
    %c0_i32_0 = arith.constant 0 : i32
    %c0_i32_1 = arith.constant 0 : i32
    return %arg0, %c0_i32, %c0_i32_0 : i32, i32, i32
  }
  func.func @transform_1(%arg0: i32) -> (i32, i32) {
    %c0_i32 = arith.constant 0 : i32
    %c0_i32_0 = arith.constant 0 : i32
    %c0_i32_1 = arith.constant 0 : i32
    return %c0_i32, %c0_i32_0 : i32, i32
  }
  func.func @transform_2(%arg0: i32) -> (i32, i32) {
    %c0_i32 = arith.constant 0 : i32
    %c0_i32_0 = arith.constant 0 : i32
    %c0_i32_1 = arith.constant 0 : i32
    return %c0_i32, %c0_i32_0 : i32, i32
  }
  func.func @transform_3(%arg0: i32) -> (i32, i32) {
    %c0_i32 = arith.constant 0 : i32
    %c0_i32_0 = arith.constant 0 : i32
    %c0_i32_1 = arith.constant 0 : i32
    return %c0_i32, %c0_i32_0 : i32, i32
  }
  func.func @transform_4(%arg0: i32) -> (i32, i32) {
    %c0_i32 = arith.constant 0 : i32
    %c0_i32_0 = arith.constant 0 : i32
    %c0_i32_1 = arith.constant 0 : i32
    return %c0_i32, %c0_i32_0 : i32, i32
  }
  func.func @transform_5(%arg0: i32) -> (i32, i32) {
    %c0_i32 = arith.constant 0 : i32
    %c0_i32_0 = arith.constant 0 : i32
    %c0_i32_1 = arith.constant 0 : i32
    return %c0_i32, %c0_i32_0 : i32, i32
  }
  func.func @transform_6(%arg0: i32) -> i32 {
    %c0_i32 = arith.constant 0 : i32
    %c0_i32_0 = arith.constant 0 : i32
    return %c0_i32 : i32
  }
  func.func @transform_7(%arg0: i32) -> (i32, i32, i32) {
    %c0_i32 = arith.constant 0 : i32
    %c0_i32_0 = arith.constant 0 : i32
    %c0_i32_1 = arith.constant 0 : i32
    return %arg0, %c0_i32, %c0_i32_0 : i32, i32, i32
  }
}

</mosaic_0001>

<bundles_post_ra>
// kernel: tpu_custom_call.1
= control target key start
LH: loop header
LB: loop body
LE: loop exit
PB: predicated region body
PF: predicated region fallthrough
CT: control target
= control target key end

     0   :  { %13 = vsyncpa [#allocation4], 0  ;;  %s1240_s0 = inlined_call_operand.hbm [shape: f32[2,32,256], index: 0, kind: input, shape index: {}]   ;;  %s1241_s1 = inlined_call_operand.vmem [shape: f32[32,8], index: 1, kind: input, shape index: {}]   ;;  %s1242_s2 = inlined_call_operand.vmem [shape: f32[1,8], index: 2, kind: input, shape index: {}]   ;;  %s1243_s3 = inlined_call_operand.vmem [shape: f32[8,32], index: 3, kind: input, shape index: {}]   ;;  %s1244_s4 = inlined_call_operand.vmem [shape: f32[1,32], index: 4, kind: input, shape index: {}]   ;;  %s1245_s5 = inlined_call_operand.hbm [shape: f32[512,256], index: 5, kind: input, shape index: {}]   ;;  %s1246_s6 = inlined_call_operand.<no memory space> [shape: f32[1], index: 6, kind: input, shape index: {}]   ;;  %s1247_s7 = inlined_call_operand.hbm [shape: f32[2,32,256], index: 7, kind: output, shape index: {}]  }
   0x1   :  { %14 = vsyncpa [#allocation7], 0 }
   0x2   :  { %15 = vsyncpa [#allocation5], 0  ;;  %s20_s26 = sshll.u32 %s1240_s0, 4  ;;  %s960_s27 = smov [#allocation3]   ;;  %s21_s26 = int_to_ptr.hbm [resolvable:$true] %s20_s26 }
   0x3   :  { %s22_s28 = sshll.u32 %s960_s27, 4  ;;  %s41_s8 = sshll.u32 %s1245_s5, 4  ;;  %s23_s28 = int_to_ptr.vmem [resolvable:$true] %s22_s28  ;;  %s42_s8 = int_to_ptr.hbm [resolvable:$true] %s41_s8 }
   0x4   :  { %s961_s9 = smov 256   ;;  %s962_s10 = smov 16  }
   0x5   :  { %28 = dma.hbm_to_vmem [thread:$0]  %s21_s26, 2048, %s23_s28, [#allocation4], %s961_s9, %s961_s9, %s962_s10  }
   0x6   :  { %s963_s11 = smov [#allocation6]  }
   0x7   :  { %s43_s12 = sshll.u32 %s963_s11, 4  ;;  %s44_s12 = int_to_ptr.vmem [resolvable:$true] %s43_s12 }
   0x8   :  { %49 = dma.hbm_to_vmem [thread:$0]  %s42_s8, 16384, %s44_s12, [#allocation7], %s961_s9, %s961_s9, %s962_s10  }
   0x9   :  { %954 = dma.done.wait [#allocation4], 2048  }
   0xa   :  { %955 = vsyncadd [#allocation4], 4294965248 }
   0xb   :  { %956 = dma.done.wait [#allocation7], 16384  }
   0xc   :  { %957 = vsyncadd [#allocation7], 4294950912  ;;  %v1019_v0 = vld [vmem:[#allocation3 + $0x40] sm:$0xff]  ;;  %v1021_v1 = vld [vmem:[#allocation3 + $0x48] sm:$0xff]  ;;  %v964_v35 = vmov 256.0   ;;  %v147_v51 = vlaneseq  ;;  %vm152_vm1 = vcmask 130112  }
   0xd   :  { %v1023_v2 = vld [vmem:[#allocation3] sm:$0xff]  ;;  %v88_v3 = vadd.f32 %v1021_v1, %v1019_v0  ;;  %v1027_v4 = vld [vmem:[#allocation3 + $0x8] sm:$0xff]  ;;  %v1037_v9 = vld [vmem:[#allocation3 + $0x50] sm:$0xff]  ;;  %v127_v25 = vmax.f32 %v1019_v0, %v1021_v1  ;;  %866 = vrcp.f32 %v964_v35  ;;  %vm156_vm2 = vcmask 195712   ;;  %s830_s26 = sshll.u32 %s1247_s7, 4  ;;  %s831_s26 = int_to_ptr.hbm [resolvable:$true] %s830_s26 }
   0xe   :  { %v1029_v5 = vld [vmem:[#allocation3 + $0x20] sm:$0xff]  ;;  %v1031_v6 = vld [vmem:[#allocation3 + $0x28] sm:$0xff]  ;;  %v76_v7 = vadd.f32 %v1027_v4, %v1023_v2  ;;  %v1039_v10 = vld [vmem:[#allocation3 + $0x58] sm:$0xff]  ;;  %v115_v24 = vmax.f32 %v1023_v2, %v1027_v4  ;;  %v148_v56 = vand.u32 127, %v147_v51  ;;  %vm160_vm3 = vcmask 261312  }
   0xf   :  { %v82_v8 = vadd.f32 %v1031_v6, %v1029_v5  ;;  %89 = vadd.xlane.f32.xlu1 %v88_v3  ;;  %v1041_v11 = vld [vmem:[#allocation3 + $0x10] sm:$0xff]  ;;  %v1043_v12 = vld [vmem:[#allocation3 + $0x18] sm:$0xff]  ;;  %v1045_v13 = vld [vmem:[#allocation3 + $0x60] sm:$0xff]  ;;  %v91_v15 = vadd.f32 %v1039_v10, %v1037_v9  ;;  %v130_v27 = vmax.f32 %v1037_v9, %v1039_v10  ;;  %v121_v29 = vmax.f32 %v1029_v5, %v1031_v6 }
  0x10   :  { %77 = vadd.xlane.f32.xlu0 %v76_v7  ;;  %v1047_v14 = vld [vmem:[#allocation3 + $0x68] sm:$0xff]  ;;  %v79_v16 = vadd.f32 %v1043_v12, %v1041_v11  ;;  %v1055_v18 = vld [vmem:[#allocation3 + $0x70] sm:$0xff]  ;;  %v1057_v19 = vld [vmem:[#allocation3 + $0x78] sm:$0xff]  ;;  %v118_v26 = vmax.f32 %v1041_v11, %v1043_v12  ;;  %v150_v58 = vadd.s32 4294967288, %v148_v56  ;;  %v154_v62 = vadd.s32 4294967280, %v148_v56 }
  0x11   :  { %83 = vadd.xlane.f32.xlu2 %v82_v8  ;;  %v94_v17 = vadd.f32 %v1047_v14, %v1045_v13  ;;  %v1059_v20 = vld [vmem:[#allocation3 + $0x30] sm:$0xff]  ;;  %v1061_v21 = vld [vmem:[#allocation3 + $0x38] sm:$0xff]  ;;  %v97_v22 = vadd.f32 %v1057_v19, %v1055_v18  ;;  %v133_v28 = vmax.f32 %v1045_v13, %v1047_v14  ;;  %v136_v31 = vmax.f32 %v1055_v18, %v1057_v19  ;;  %v200_v42 = vld [vmem:[%s1241_s1 + $0x8] sm:$0xff] }
  0x12   :  { %v85_v23 = vadd.f32 %v1061_v21, %v1059_v20  ;;  %v124_v30 = vmax.f32 %v1059_v20, %v1061_v21  ;;  %v202_v36 = vld [vmem:[%s1241_s1 + $0x18] sm:$0xff]  ;;  %v201_v41 = vld [vmem:[%s1241_s1 + $0x10] sm:$0xff]  ;;  %v199_v44 = vld [vmem:[%s1241_s1] sm:$0xff]  ;;  %v158_v8 = vadd.s32 4294967272, %v148_v56  ;;  %vm169_vm4 = vcmask 1041409  }
  0x13   :  { %223 = vmatpush.msra.mxu0 %v202_v36  ;;  %v867_v38 = vpop.eup %866  ;;  %vm194_vm5 = vcmask 1043459   ;;  %vm197_vm6 = vcmask 1041408   ;;  %vm207_vm7 = vcmask 261120   ;;  %vm237_vm8 = vcmask 64512  }
  0x14   :  { %v101_v43 = vmul.f32 256.0, %v867_v38  ;;  %vm105_vm0 = vweird.f32 %v867_v38 }
  0x15   :  { %224 = vmatpush.msra.mxu0 %v201_v41 }
  0x16   :  { %v102_v45 = vsub.f32 1.0, %v101_v43 }
  0x17   :  { %92 = vadd.xlane.f32.xlu1 %v91_v15  ;;  %225 = vmatpush.msra.mxu0 %v200_v42 }
  0x18   :  { %80 = vadd.xlane.f32.xlu0 %v79_v16  ;;  %v103_v49 = vmul.f32 %v867_v38, %v102_v45 }
  0x19   :  { %95 = vadd.xlane.f32.xlu2 %v94_v17  ;;  %226 = vmatpush.msra.mxu0 %v199_v44 }
  0x1a   :  { %v104_v50 = vadd.f32 %v867_v38, %v103_v49 }
  0x1c   :  { %v106_v55 = vsel %vm105_vm0, %v867_v38, %v104_v50 }
  0x1f   :  { %98 = vadd.xlane.f32.xlu1 %v97_v22 }
  0x20   :  { %86 = vadd.xlane.f32.xlu0 %v85_v23 }
  0x21   :  { %116 = vmax.xlane.f32.xlu2 %v115_v24 }
  0x27   :  { %128 = vmax.xlane.f32.xlu1 %v127_v25 }
  0x28   :  { %119 = vmax.xlane.f32.xlu0 %v118_v26 }
  0x29   :  { %131 = vmax.xlane.f32.xlu2 %v130_v27 }
  0x2f   :  { %134 = vmax.xlane.f32.xlu1 %v133_v28 }
  0x30   :  { %122 = vmax.xlane.f32.xlu0 %v121_v29 }
  0x31   :  { %125 = vmax.xlane.f32.xlu2 %v124_v30 }
  0x38   :  { %137 = vmax.xlane.f32.xlu0 %v136_v31 }
  0x82   :  { %v90_v32 = vpop.xlane.xlu1 %89 }
  0x83   :  { %v78_v33 = vpop.xlane.xlu0 %77  ;;  %v111_v57 = vmul.f32 %v106_v55, %v90_v32 }
  0x84   :  { %v84_v34 = vpop.xlane.xlu2 %83  ;;  %v107_v61 = vmul.f32 %v106_v55, %v78_v33 }
  0x85   :  { %v162_v63 = vperm.slane %v111_v57, %v148_v56  ;;  %v109_v3 = vmul.f32 %v106_v55, %v84_v34  ;;  %v864_v57 = vld [vmem:[%s1242_s2] ss:$0 sm:$0xff] }
  0x86   :  { %v149_v24 = vperm.slane %v107_v61, %v148_v56  ;;  %v286_v61 = vshrl.u32 %v147_v51, 7 }
  0x87   :  { %v155_v30 = vperm.slane %v109_v3, %v154_v62 }
  0x88   :  { %858 = vset.pattern.permute.xlu0 %v286_v61  ;;  %856 = vset.pattern.permute.xlu1 %v286_v61 }
  0x8a   :  { %v93_v37 = vpop.xlane.xlu1 %92 }
  0x8b   :  { %v81_v39 = vpop.xlane.xlu0 %80  ;;  %v112_v59 = vmul.f32 %v106_v55, %v93_v37 }
  0x8c   :  { %v96_v40 = vpop.xlane.xlu2 %95  ;;  %v108_v60 = vmul.f32 %v106_v55, %v81_v39 }
  0x8d   :  { %v113_v7 = vmul.f32 %v106_v55, %v96_v40  ;;  %v163_v16 = vperm.slane %v112_v59, %v150_v58 }
  0x8e   :  { %v151_v17 = vperm.slane %v108_v60, %v150_v58 }
  0x8f   :  { %v165_v31 = vperm.slane %v113_v7, %v154_v62  ;;  %v164_v34 = vsel %vm152_vm1, %v163_v16, %v162_v63  ;;  %v865_v63 = vld [vmem:[%s1244_s4] ss:$0 sm:$0xff]  ;;  %s966_s4 = smov [#allocation8]  }
  0x90   :  { %v153_v35 = vsel %vm152_vm1, %v151_v17, %v149_v24 }
  0x91   :  { %v166_v42 = vsel %vm156_vm2, %v165_v31, %v164_v34  ;;  %v157_v45 = vsel %vm156_vm2, %v155_v30, %v153_v35  ;;  %v299_v34 = vadd.s32 16, %v286_v61  ;;  %v305_v35 = vadd.s32 24, %v286_v61 }
  0x92   :  { %v99_v46 = vpop.xlane.xlu1 %98 }
  0x93   :  { %v87_v47 = vpop.xlane.xlu0 %86  ;;  %v114_v22 = vmul.f32 %v106_v55, %v99_v46 }
  0x94   :  { %v117_v48 = vpop.xlane.xlu2 %116  ;;  %v110_v23 = vmul.f32 %v106_v55, %v87_v47 }
  0x95   :  { %v180_v25 = vperm.slane %v117_v48, %v148_v56  ;;  %v167_v36 = vperm.slane %v114_v22, %v158_v8 }
  0x96   :  { %v159_v37 = vperm.slane %v110_v23, %v158_v8 }
  0x97   :  { %v168_v48 = vsel %vm160_vm3, %v167_v36, %v166_v42  ;;  %v543_v36 = vld [vmem:[#allocation6 + $0x2f0] sm:$0xff]  ;;  %v477_v42 = vld [vmem:[#allocation6 + $0xe0] sm:$0xff] }
  0x98   :  { %v161_v47 = vsel %vm160_vm3, %v159_v37, %v157_v45  ;;  %v575_v37 = vld [vmem:[#allocation6 + $0x3f0] sm:$0xff] }
  0x99   :  { %639 = vmatpush.msrb.mxu0 %v575_v37  ;;  %v571_v45 = vld [vmem:[#allocation6 + $0x3d0] sm:$0xff] }
  0x9a   :  { %v129_v53 = vpop.xlane.xlu1 %128  ;;  %v551_v37 = vld [vmem:[#allocation6 + $0x330] sm:$0xff] }
  0x9b   :  { %v120_v52 = vpop.xlane.xlu0 %119  ;;  %v187_v26 = vperm.slane %v129_v53, %v148_v56  ;;  %v170_v53 = vsel %vm169_vm4, %v168_v48, %v161_v47  ;;  %v232_v56 = vld [vmem:[%s1243_s3] sm:$0xff]  ;;  %v507_v47 = vld [vmem:[#allocation6 + $0x1d0] sm:$0xff] }
  0x9c   :  { %v132_v54 = vpop.xlane.xlu2 %131  ;;  %v181_v27 = vperm.slane %v120_v52, %v150_v58  ;;  %256 = vmatpush.msra.mxu1 %v232_v56  ;;  %v537_v48 = vld [vmem:[#allocation6 + $0x2c0] sm:$0xff]  ;;  %v503_v56 = vld [vmem:[#allocation6 + $0x1b0] sm:$0xff] }
  0x9d   :  { %v188_v28 = vperm.slane %v132_v54, %v150_v58 }
  0x9e   :  { %v182_v39 = vsel %vm152_vm1, %v181_v27, %v180_v25  ;;  %619 = vmatpush.msrb.mxu1 %v543_v36  ;;  %v519_v36 = vld [vmem:[#allocation6 + $0x230] sm:$0xff] }
  0x9f   :  { %v189_v40 = vsel %vm152_vm1, %v188_v28, %v187_v26 }
  0xa2   :  { %v135_v29 = vpop.xlane.xlu1 %134 }
  0xa3   :  { %v123_v15 = vpop.xlane.xlu0 %122  ;;  %v190_v38 = vperm.slane %v135_v29, %v154_v62 }
  0xa4   :  { %v183_v32 = vperm.slane %v123_v15, %v154_v62  ;;  %v126_v33 = vpop.xlane.xlu2 %125  ;;  %v293_v62 = vadd.s32 8, %v286_v61  ;;  %v531_v61 = vld [vmem:[#allocation6 + $0x290] sm:$0xff] }
  0xa5   :  { %v185_v41 = vperm.slane %v126_v33, %v158_v8  ;;  %v191_v49 = vsel %vm156_vm2, %v190_v38, %v189_v40  ;;  %v479_v38 = vld [vmem:[#allocation6 + $0xf0] sm:$0xff]  ;;  %v541_v40 = vld [vmem:[#allocation6 + $0x2e0] sm:$0xff] }
  0xa6   :  { %v184_v43 = vsel %vm156_vm2, %v183_v32, %v182_v39  ;;  %857 = vset.pattern.permute.xlu2 %v293_v62  ;;  %v511_v39 = vld [vmem:[#allocation6 + $0x1f0] sm:$0xff]  ;;  %579 = vmatpush.msra.mxu2 %v479_v38 }
  0xa7   :  { %v186_v50 = vsel %vm160_vm3, %v185_v41, %v184_v43  ;;  %v573_v41 = vld [vmem:[#allocation6 + $0x3e0] sm:$0xff]  ;;  %599 = vmatpush.msra.mxu3 %v511_v39  ;;  %620 = vmatpush.msrb.mxu1 %v541_v40  ;;  %v563_v62 = vld [vmem:[#allocation6 + $0x390] sm:$0xff] }
  0xa8   :  { %v509_v43 = vld [vmem:[#allocation6 + $0x1e0] sm:$0xff]  ;;  %640 = vmatpush.msrb.mxu0 %v573_v41  ;;  %580 = vmatpush.msra.mxu2 %v477_v42  ;;  %v455_v39 = vld [vmem:[#allocation6 + $0x30] sm:$0xff] }
  0xa9   :  { %600 = vmatpush.msra.mxu3 %v509_v43  ;;  %v487_v40 = vld [vmem:[#allocation6 + $0x130] sm:$0xff]  ;;  %v517_v41 = vld [vmem:[#allocation6 + $0x220] sm:$0xff] }
  0xaa   :  { %641 = vmatpush.msrb.mxu0 %v571_v45  ;;  %v549_v42 = vld [vmem:[#allocation6 + $0x320] sm:$0xff]  ;;  %v515_v45 = vld [vmem:[#allocation6 + $0x210] sm:$0xff] }
  0xab   :  { %v138_v44 = vpop.xlane.xlu0 %137  ;;  %601 = vmatpush.msra.mxu3 %v507_v47  ;;  %v453_v43 = vld [vmem:[#allocation6 + $0x20] sm:$0xff]  ;;  %v451_v47 = vld [vmem:[#allocation6 + $0x10] sm:$0xff] }
  0xac   :  { %v192_v46 = vperm.slane %v138_v44, %v158_v8  ;;  %v539_v44 = vld [vmem:[#allocation6 + $0x2d0] sm:$0xff] }
  0xad   :  { %621 = vmatpush.msrb.mxu1 %v539_v44  ;;  %v485_v44 = vld [vmem:[#allocation6 + $0x120] sm:$0xff] }
  0xae   :  { %v193_v52 = vsel %vm160_vm3, %v192_v46, %v191_v49  ;;  %v475_v46 = vld [vmem:[#allocation6 + $0xd0] sm:$0xff]  ;;  %v569_v49 = vld [vmem:[#allocation6 + $0x3c0] sm:$0xff] }
  0xaf   :  { %v195_v54 = vsel %vm194_vm5, %v193_v52, %v186_v50  ;;  %581 = vmatpush.msra.mxu2 %v475_v46  ;;  %622 = vmatpush.msrb.mxu1 %v537_v48  ;;  %v473_v50 = vld [vmem:[#allocation6 + $0xc0] sm:$0xff]  ;;  %v547_v46 = vld [vmem:[#allocation6 + $0x310] sm:$0xff] }
  0xb0   :  { %v198_v55 = vsel %vm197_vm6, %v170_v53, %v195_v54  ;;  %642 = vmatpush.msrb.mxu0 %v569_v49  ;;  %v505_v52 = vld [vmem:[#allocation6 + $0x1c0] sm:$0xff]  ;;  %v535_v53 = vld [vmem:[#allocation6 + $0x2b0] sm:$0xff]  ;;  %vm780_vm6 = vcmask 1040384  }
  0xb1   :  { %844 = vmatmul.msk.f32.vlgmr.msra.gmra.mxu0 %vm207_vm7, %v198_v55  ;;  %582 = vmatpush.msra.mxu2 %v473_v50  ;;  %v567_v54 = vld [vmem:[#allocation6 + $0x3b0] sm:$0xff]  ;;  %v513_v49 = vld [vmem:[#allocation6 + $0x200] sm:$0xff] }
  0xb2   :  { %602 = vmatpush.msra.mxu3 %v505_v52  ;;  %v471_v55 = vld [vmem:[#allocation6 + $0xb0] sm:$0xff]  ;;  %623 = vmatpush.msrb.mxu1 %v535_v53  ;;  %v545_v50 = vld [vmem:[#allocation6 + $0x300] sm:$0xff]  ;;  %v544_v52 = vld [vmem:[#allocation6 + $0x2f8] sm:$0xff] }
  0xb3   :  { %643 = vmatpush.msrb.mxu0 %v567_v54  ;;  %583 = vmatpush.msra.mxu2 %v471_v55  ;;  %v483_v48 = vld [vmem:[#allocation6 + $0x110] sm:$0xff]  ;;  %v576_v53 = vld [vmem:[#allocation6 + $0x3f8] sm:$0xff]  ;;  %v449_v54 = vld [vmem:[#allocation6] sm:$0xff] }
  0xb4   :  { %603 = vmatpush.msra.mxu3 %v503_v56  ;;  %v481_v55 = vld [vmem:[#allocation6 + $0x100] sm:$0xff]  ;;  %v480_v56 = vld [vmem:[#allocation6 + $0xf8] sm:$0xff] }
 0x12e   :  { %v228_v58 = vpop.f32.mrf.mxu0 }
 0x12f   :  { %v229_v59 = vadd.f32 %v864_v57, %v228_v58  ;;  %v533_v57 = vld [vmem:[#allocation6 + $0x2a0] sm:$0xff] }
 0x130   :  { %v565_v58 = vld [vmem:[#allocation6 + $0x3a0] sm:$0xff]  ;;  %624 = vmatpush.msrb.mxu1 %v533_v57  ;;  %v512_v57 = vld [vmem:[#allocation6 + $0x1f8] sm:$0xff] }
 0x131   :  { %v231_v60 = vmax.f32 %v229_v59, 0.0  ;;  %v469_v59 = vld [vmem:[#allocation6 + $0xa0] sm:$0xff]  ;;  %644 = vmatpush.msrb.mxu0 %v565_v58  ;;  %v542_v58 = vld [vmem:[#allocation6 + $0x2e8] sm:$0xff] }
 0x132   :  { %584 = vmatpush.msra.mxu2 %v469_v59  ;;  %625 = vmatpush.msrb.mxu1 %v531_v61  ;;  %v574_v59 = vld [vmem:[#allocation6 + $0x3e8] sm:$0xff] }
 0x133   :  { %845 = vmatmul.msk.f32.vlgmr.msra.gmra.mxu1 %vm237_vm8, %v231_v60  ;;  %v501_v60 = vld [vmem:[#allocation6 + $0x1a0] sm:$0xff]  ;;  %645 = vmatpush.msrb.mxu0 %v563_v62  ;;  %v510_v61 = vld [vmem:[#allocation6 + $0x1e8] sm:$0xff]  ;;  %v540_v62 = vld [vmem:[#allocation6 + $0x2d8] sm:$0xff] }
 0x134   :  { %604 = vmatpush.msra.mxu3 %v501_v60  ;;  %v478_v60 = vld [vmem:[#allocation6 + $0xe8] sm:$0xff] }
 0x1b0   :  { %v258_v3 = vpop.f32.mrf.mxu1 }
 0x1b1   :  { %v259_v7 = vadd.f32 %v865_v63, %v258_v3  ;;  %v467_v63 = vld [vmem:[#allocation6 + $0x90] sm:$0xff] }
 0x1b2   :  { %v499_v3 = vld [vmem:[#allocation6 + $0x190] sm:$0xff]  ;;  %585 = vmatpush.msra.mxu2 %v467_v63 }
 0x1b3   :  { %v262_v8 = vrot.slane %v259_v7, 2  ;;  %605 = vmatpush.msra.mxu3 %v499_v3  ;;  %v572_v3 = vld [vmem:[#allocation6 + $0x3d8] sm:$0xff] }
 0x1b5   :  { %v264_v15 = vadd.f32 %v262_v8, %v259_v7  ;;  %v529_v7 = vld [vmem:[#allocation6 + $0x280] sm:$0xff] }
 0x1b6   :  { %v561_v8 = vld [vmem:[#allocation6 + $0x380] sm:$0xff]  ;;  %626 = vmatpush.msrb.mxu1 %v529_v7  ;;  %v476_v7 = vld [vmem:[#allocation6 + $0xd8] sm:$0xff] }
 0x1b7   :  { %v846_v16 = vmul.f32 -1.442695, %v264_v15  ;;  %v465_v15 = vld [vmem:[#allocation6 + $0x80] sm:$0xff]  ;;  %646 = vmatpush.msrb.mxu0 %v561_v8  ;;  %v508_v8 = vld [vmem:[#allocation6 + $0x1d8] sm:$0xff] }
 0x1b8   :  { %586 = vmatpush.msra.mxu2 %v465_v15  ;;  %v538_v15 = vld [vmem:[#allocation6 + $0x2c8] sm:$0xff] }
 0x1b9   :  { %868 = vpow2.f32 %v846_v16  ;;  %v497_v16 = vld [vmem:[#allocation6 + $0x180] sm:$0xff] }
 0x1ba   :  { %606 = vmatpush.msra.mxu3 %v497_v16  ;;  %v570_v16 = vld [vmem:[#allocation6 + $0x3c8] sm:$0xff] }
 0x1bf   :  { %v869_v17 = vpop.eup %868 }
 0x1c0   :  { %v268_v22 = vadd.f32 1.0, %v869_v17  ;;  %v527_v17 = vld [vmem:[#allocation6 + $0x270] sm:$0xff] }
 0x1c1   :  { %627 = vmatpush.msrb.mxu1 %v527_v17  ;;  %v474_v17 = vld [vmem:[#allocation6 + $0xc8] sm:$0xff] }
 0x1c2   :  { %870 = vrcp.f32 %v268_v22  ;;  %v280_v25 = vand.u32 2147483648, %v268_v22  ;;  %v278_v27 = vand.u32 2147483647, %v268_v22  ;;  %vm274_vm10 = vweird.f32 %v268_v22 }
 0x1c4   :  { %v281_v29 = vor.u32 1.1754944e-38, %v280_v25  ;;  %vm279_vm12 = vcmp.eq.f32.partialorder %v278_v27, 8.507059e+37  ;;  %v557_v25 = vld [vmem:[#allocation6 + $0x360] sm:$0xff] }
 0x1c5   :  { %v493_v27 = vld [vmem:[#allocation6 + $0x160] sm:$0xff] }
 0x1c8   :  { %v871_v23 = vpop.eup %870 }
 0x1c9   :  { %v270_v24 = vmul.f32 %v871_v23, %v268_v22  ;;  %vm275_vm9 = vweird.f32 %v871_v23  ;;  %v559_v22 = vld [vmem:[#allocation6 + $0x370] sm:$0xff] }
 0x1ca   :  { %vm276_vm11 = vmor %vm274_vm10, %vm275_vm9  ;;  %647 = vmatpush.msrb.mxu0 %v559_v22  ;;  %v506_v22 = vld [vmem:[#allocation6 + $0x1c8] sm:$0xff] }
 0x1cb   :  { %v271_v51 = vsub.f32 1.0, %v270_v24  ;;  %v495_v24 = vld [vmem:[#allocation6 + $0x170] sm:$0xff] }
 0x1cc   :  { %607 = vmatpush.msra.mxu3 %v495_v24  ;;  %648 = vmatpush.msrb.mxu0 %v557_v25  ;;  %v568_v24 = vld [vmem:[#allocation6 + $0x3b8] sm:$0xff] }
 0x1cd   :  { %v272_v26 = vmul.f32 %v871_v23, %v271_v51  ;;  %v525_v51 = vld [vmem:[#allocation6 + $0x260] sm:$0xff]  ;;  %v504_v25 = vld [vmem:[#allocation6 + $0x1b8] sm:$0xff] }
 0x1ce   :  { %628 = vmatpush.msrb.mxu1 %v525_v51  ;;  %608 = vmatpush.msra.mxu3 %v493_v27  ;;  %v472_v51 = vld [vmem:[#allocation6 + $0xb8] sm:$0xff]  ;;  %v566_v27 = vld [vmem:[#allocation6 + $0x3a8] sm:$0xff] }
 0x1cf   :  { %v273_v28 = vadd.f32 %v871_v23, %v272_v26  ;;  %v461_v26 = vld [vmem:[#allocation6 + $0x60] sm:$0xff] }
 0x1d1   :  { %v277_v30 = vsel %vm276_vm11, %v871_v23, %v273_v28  ;;  %v463_v23 = vld [vmem:[#allocation6 + $0x70] sm:$0xff] }
 0x1d2   :  { %v282_v31 = vsel %vm279_vm12, %v281_v29, %v277_v30  ;;  %587 = vmatpush.msra.mxu2 %v463_v23  ;;  %v523_v28 = vld [vmem:[#allocation6 + $0x250] sm:$0xff]  ;;  %v536_v23 = vld [vmem:[#allocation6 + $0x2b8] sm:$0xff] }
 0x1d3   :  { %v309_v32 = vperm.slane %v282_v31, 1  ;;  %v284_v33 = vperm.slane %v282_v31, 0  ;;  %v555_v29 = vld [vmem:[#allocation6 + $0x350] sm:$0xff]  ;;  %629 = vmatpush.msrb.mxu1 %v523_v28 }
 0x1d4   :  { %588 = vmatpush.msra.mxu2 %v461_v26  ;;  %649 = vmatpush.msrb.mxu0 %v555_v29  ;;  %v459_v30 = vld [vmem:[#allocation6 + $0x50] sm:$0xff]  ;;  %v534_v26 = vld [vmem:[#allocation6 + $0x2a8] sm:$0xff] }
 0x1d5   :  { %314 = vperm.xlu0 %858, %v309_v32   ;;  %295 = vperm.xlu2 %857, %v284_v33   ;;  %v491_v31 = vld [vmem:[#allocation6 + $0x150] sm:$0xff] }
 0x1d6   :  { %289 = vperm.xlu1 %856, %v284_v33   ;;  %589 = vmatpush.msra.mxu2 %v459_v30  ;;  %v470_v30 = vld [vmem:[#allocation6 + $0xa8] sm:$0xff] }
 0x1d7   :  { %609 = vmatpush.msra.mxu3 %v491_v31  ;;  %v502_v31 = vld [vmem:[#allocation6 + $0x1a8] sm:$0xff] }
 0x1dd   :  { %320 = vperm.xlu2 %857, %v309_v32   ;;  %863 = vset.pattern.permute.xlu0 %v305_v35 }
 0x1de   :  { %859 = vset.pattern.permute.xlu1 %v299_v34 }
 0x1e5   :  { %860 = vset.pattern.permute.xlu2 %v299_v34  ;;  %v457_v34 = vld [vmem:[#allocation6 + $0x40] sm:$0xff] }
 0x1e6   :  { %301 = vperm.xlu1 %859, %v284_v33   ;;  %590 = vmatpush.msra.mxu2 %v457_v34  ;;  %v468_v34 = vld [vmem:[#allocation6 + $0x98] sm:$0xff] }
 0x1e8   :  { %591 = vmatpush.msra.mxu2 %v455_v39  ;;  %v530_v39 = vld [vmem:[#allocation6 + $0x288] sm:$0xff] }
 0x1ea   :  { %592 = vmatpush.msra.mxu2 %v453_v43 }
 0x1ec   :  { %593 = vmatpush.msra.mxu2 %v451_v47 }
 0x1ed   :  { %326 = vperm.xlu2 %860, %v309_v32  }
 0x1ee   :  { %861 = vset.pattern.permute.xlu1 %v305_v35  ;;  %594 = vmatpush.msra.mxu2 %v449_v54  ;;  %v462_v54 = vld [vmem:[#allocation6 + $0x68] sm:$0xff] }
 0x1f0   :  { %659 = vmatpush.msrb.mxu2 %v480_v56 }
 0x1f2   :  { %660 = vmatpush.msrb.mxu2 %v478_v60 }
 0x1f4   :  { %661 = vmatpush.msrb.mxu2 %v476_v7 }
 0x1f5   :  { %862 = vset.pattern.permute.xlu2 %v305_v35  ;;  %v489_v35 = vld [vmem:[#allocation6 + $0x140] sm:$0xff] }
 0x1f6   :  { %307 = vperm.xlu1 %861, %v284_v33   ;;  %v553_v33 = vld [vmem:[#allocation6 + $0x340] sm:$0xff]  ;;  %610 = vmatpush.msra.mxu3 %v489_v35  ;;  %v500_v35 = vld [vmem:[#allocation6 + $0x198] sm:$0xff] }
 0x1f7   :  { %650 = vmatpush.msrb.mxu0 %v553_v33  ;;  %662 = vmatpush.msrb.mxu2 %v474_v17  ;;  %v564_v33 = vld [vmem:[#allocation6 + $0x398] sm:$0xff]  ;;  %v458_v17 = vld [vmem:[#allocation6 + $0x48] sm:$0xff] }
 0x1f8   :  { %611 = vmatpush.msra.mxu3 %v487_v40  ;;  %v562_v40 = vld [vmem:[#allocation6 + $0x388] sm:$0xff] }
 0x1f9   :  { %651 = vmatpush.msrb.mxu0 %v551_v37  ;;  %663 = vmatpush.msrb.mxu2 %v472_v51 }
 0x1fa   :  { %612 = vmatpush.msra.mxu3 %v485_v44 }
 0x1fb   :  { %652 = vmatpush.msrb.mxu0 %v549_v42  ;;  %664 = vmatpush.msrb.mxu2 %v470_v30  ;;  %v498_v42 = vld [vmem:[#allocation6 + $0x188] sm:$0xff] }
 0x1fc   :  { %613 = vmatpush.msra.mxu3 %v483_v48 }
 0x1fd   :  { %332 = vperm.xlu2 %862, %v309_v32   ;;  %v521_v32 = vld [vmem:[#allocation6 + $0x240] sm:$0xff]  ;;  %653 = vmatpush.msrb.mxu0 %v547_v46  ;;  %v496_v46 = vld [vmem:[#allocation6 + $0x178] sm:$0xff] }
 0x1fe   :  { %630 = vmatpush.msrb.mxu1 %v521_v32  ;;  %614 = vmatpush.msra.mxu3 %v481_v55  ;;  %v532_v32 = vld [vmem:[#allocation6 + $0x298] sm:$0xff] }
 0x1ff   :  { %654 = vmatpush.msrb.mxu0 %v545_v50  ;;  %665 = vmatpush.msrb.mxu2 %v468_v34  ;;  %v454_v34 = vld [vmem:[#allocation6 + $0x28] sm:$0xff] }
 0x200   :  { %631 = vmatpush.msrb.mxu1 %v519_v36  ;;  %679 = vmatpush.msrb.mxu3 %v512_v57 }
 0x201   :  { %719 = vmatpush.msra.mxu0 %v576_v53 }
 0x202   :  { %632 = vmatpush.msrb.mxu1 %v517_v41  ;;  %680 = vmatpush.msrb.mxu3 %v510_v61  ;;  %v466_v41 = vld [vmem:[#allocation6 + $0x88] sm:$0xff] }
 0x203   :  { %720 = vmatpush.msra.mxu0 %v574_v59  ;;  %666 = vmatpush.msrb.mxu2 %v466_v41  ;;  %v556_v59 = vld [vmem:[#allocation6 + $0x358] sm:$0xff] }
 0x204   :  { %633 = vmatpush.msrb.mxu1 %v515_v45  ;;  %681 = vmatpush.msrb.mxu3 %v508_v8  ;;  %v560_v45 = vld [vmem:[#allocation6 + $0x378] sm:$0xff] }
 0x205   :  { %721 = vmatpush.msra.mxu0 %v572_v3  ;;  %v965_v3 = vmov 32.0  }
 0x206   :  { %634 = vmatpush.msrb.mxu1 %v513_v49  ;;  %682 = vmatpush.msrb.mxu3 %v506_v22  ;;  %v558_v49 = vld [vmem:[#allocation6 + $0x368] sm:$0xff]  ;;  %872 = vrcp.f32 %v965_v3 }
 0x207   :  { %722 = vmatpush.msra.mxu0 %v570_v16  ;;  %v554_v16 = vld [vmem:[#allocation6 + $0x348] sm:$0xff] }
 0x208   :  { %699 = vmatpush.msra.mxu1 %v544_v52  ;;  %683 = vmatpush.msrb.mxu3 %v504_v25  ;;  %v490_v22 = vld [vmem:[#allocation6 + $0x148] sm:$0xff]  ;;  %v552_v25 = vld [vmem:[#allocation6 + $0x338] sm:$0xff] }
 0x209   :  { %723 = vmatpush.msra.mxu0 %v568_v24 }
 0x20a   :  { %700 = vmatpush.msra.mxu1 %v542_v58  ;;  %684 = vmatpush.msrb.mxu3 %v502_v31 }
 0x20b   :  { %724 = vmatpush.msra.mxu0 %v566_v27  ;;  %v488_v27 = vld [vmem:[#allocation6 + $0x138] sm:$0xff] }
 0x20c   :  { %701 = vmatpush.msra.mxu1 %v540_v62  ;;  %685 = vmatpush.msrb.mxu3 %v500_v35  ;;  %v460_v62 = vld [vmem:[#allocation6 + $0x58] sm:$0xff]  ;;  %v486_v35 = vld [vmem:[#allocation6 + $0x128] sm:$0xff] }
 0x20d   :  { %725 = vmatpush.msra.mxu0 %v564_v33  ;;  %v550_v33 = vld [vmem:[#allocation6 + $0x328] sm:$0xff] }
 0x20e   :  { %702 = vmatpush.msra.mxu1 %v538_v15  ;;  %686 = vmatpush.msrb.mxu3 %v498_v42 }
 0x20f   :  { %726 = vmatpush.msra.mxu0 %v562_v40 }
 0x210   :  { %703 = vmatpush.msra.mxu1 %v536_v23  ;;  %687 = vmatpush.msrb.mxu3 %v496_v46  ;;  %v520_v23 = vld [vmem:[#allocation6 + $0x238] sm:$0xff] }
 0x211   :  { %727 = vmatpush.msra.mxu0 %v560_v45  ;;  %v548_v45 = vld [vmem:[#allocation6 + $0x318] sm:$0xff] }
 0x212   :  { %704 = vmatpush.msra.mxu1 %v534_v26  ;;  %v456_v26 = vld [vmem:[#allocation6 + $0x38] sm:$0xff] }
 0x213   :  { %728 = vmatpush.msra.mxu0 %v558_v49 }
 0x214   :  { %705 = vmatpush.msra.mxu1 %v532_v32  ;;  %v518_v32 = vld [vmem:[#allocation6 + $0x228] sm:$0xff] }
 0x215   :  { %729 = vmatpush.msra.mxu0 %v556_v59 }
 0x216   :  { %706 = vmatpush.msra.mxu1 %v530_v39 }
 0x217   :  { %730 = vmatpush.msra.mxu0 %v554_v16 }
 0x219   :  { %731 = vmatpush.msra.mxu0 %v552_v25 }
 0x21b   :  { %732 = vmatpush.msra.mxu0 %v550_v33 }
 0x21d   :  { %733 = vmatpush.msra.mxu0 %v548_v45 }
 0x22f   :  { %v1119_v38 = vpop.permute.xlu2 %295 }
 0x230   :  { %v1175_v46 = vmul.f32 %v1119_v38, %v1043_v12  ;;  %v546_v12 = vld [vmem:[#allocation6 + $0x308] sm:$0xff] }
 0x231   :  { %734 = vmatpush.msra.mxu0 %v546_v12 }
 0x237   :  { %v321_v63 = vpop.permute.xlu2 %320 }
 0x238   :  { %v1128_v43 = vmul.f32 %v321_v63, %v1037_v9  ;;  %v1131_v44 = vmul.f32 %v321_v63, %v1039_v10  ;;  %v526_v9 = vld [vmem:[#allocation6 + $0x268] sm:$0xff]  ;;  %v492_v63 = vld [vmem:[#allocation6 + $0x158] sm:$0xff] }
 0x247   :  { %v315_v28 = vpop.permute.xlu0 %314  ;;  %v327_v29 = vpop.permute.xlu2 %326 }
 0x248   :  { %v1122_v36 = vmul.f32 %v315_v28, %v1019_v0  ;;  %v1125_v37 = vmul.f32 %v315_v28, %v1021_v1  ;;  %v528_v0 = vld [vmem:[#allocation6 + $0x278] sm:$0xff]  ;;  %v1140_v50 = vmul.f32 %v327_v29, %v1045_v13  ;;  %v1143_v52 = vmul.f32 %v327_v29, %v1047_v14  ;;  %v290_v56 = vpop.permute.xlu1 %289  ;;  %v494_v13 = vld [vmem:[#allocation6 + $0x168] sm:$0xff]  ;;  %v1161_v28 = vpop.eup %872 }
 0x249   :  { %v464_v1 = vld [vmem:[#allocation6 + $0x78] sm:$0xff]  ;;  %707 = vmatpush.msra.mxu1 %v528_v0  ;;  %688 = vmatpush.msrb.mxu3 %v494_v13  ;;  %v1164_v39 = vmul.f32 %v290_v56, %v1023_v2  ;;  %v1167_v40 = vmul.f32 %v290_v56, %v1027_v4  ;;  %v387_v2 = vmul.f32 32.0, %v1161_v28  ;;  %v482_v56 = vld [vmem:[#allocation6 + $0x108] sm:$0xff]  ;;  %vm391_vm13 = vweird.f32 %v1161_v28 }
 0x24a   :  { %v368_v47 = vadd.f32 %v1128_v43, %v1122_v36  ;;  %v377_v48 = vadd.f32 %v1131_v44, %v1125_v37  ;;  %v415_v10 = vmax.f32 %v1122_v36, %v1128_v43  ;;  %v424_v55 = vmax.f32 %v1125_v37, %v1131_v44  ;;  %667 = vmatpush.msrb.mxu2 %v464_v1  ;;  %v524_v14 = vld [vmem:[#allocation6 + $0x258] sm:$0xff] }
 0x24b   :  { %708 = vmatpush.msra.mxu1 %v526_v9  ;;  %689 = vmatpush.msrb.mxu3 %v492_v63  ;;  %v516_v0 = vld [vmem:[#allocation6 + $0x218] sm:$0xff]  ;;  %v1171_v1 = vmul.f32 %v1119_v38, %v1041_v11  ;;  %v450_v38 = vld [vmem:[#allocation6 + $0x8] sm:$0xff]  ;;  %v406_v13 = vmax.f32 %v1167_v40, %v1175_v46 }
 0x24c   :  { %v369_v60 = vadd.f32 %v368_v47, %v1140_v50  ;;  %v378_v61 = vadd.f32 %v377_v48, %v1143_v52  ;;  %668 = vmatpush.msrb.mxu2 %v462_v54  ;;  %v425_v7 = vmax.f32 %v424_v55, %v1143_v52  ;;  %v452_v4 = vld [vmem:[#allocation6 + $0x18] sm:$0xff] }
 0x24d   :  { %709 = vmatpush.msra.mxu1 %v524_v14  ;;  %690 = vmatpush.msrb.mxu3 %v490_v22  ;;  %v484_v11 = vld [vmem:[#allocation6 + $0x118] sm:$0xff]  ;;  %v388_v14 = vsub.f32 1.0, %v387_v2 }
 0x24e   :  { %669 = vmatpush.msrb.mxu2 %v460_v62 }
 0x24f   :  { %691 = vmatpush.msrb.mxu3 %v488_v27 }
 0x250   :  { %670 = vmatpush.msrb.mxu2 %v458_v17 }
 0x251   :  { %692 = vmatpush.msrb.mxu3 %v486_v35 }
 0x252   :  { %671 = vmatpush.msrb.mxu2 %v456_v26 }
 0x253   :  { %693 = vmatpush.msrb.mxu3 %v484_v11 }
 0x254   :  { %672 = vmatpush.msrb.mxu2 %v454_v34 }
 0x255   :  { %694 = vmatpush.msrb.mxu3 %v482_v56 }
 0x256   :  { %673 = vmatpush.msrb.mxu2 %v452_v4 }
 0x257   :  { %v333_v53 = vpop.permute.xlu2 %332 }
 0x258   :  { %v1148_v57 = vmul.f32 %v333_v53, %v1055_v18  ;;  %v1151_v58 = vmul.f32 %v333_v53, %v1057_v19  ;;  %v416_v18 = vmax.f32 %v415_v10, %v1140_v50  ;;  %v522_v19 = vld [vmem:[#allocation6 + $0x248] sm:$0xff]  ;;  %v302_v31 = vpop.permute.xlu1 %301  ;;  %v359_v53 = vadd.f32 %v1175_v46, %v1167_v40  ;;  %674 = vmatpush.msrb.mxu2 %v450_v38 }
 0x259   :  { %710 = vmatpush.msra.mxu1 %v522_v19  ;;  %v1178_v47 = vmul.f32 %v302_v31, %v1029_v5  ;;  %v1182_v49 = vmul.f32 %v302_v31, %v1031_v6  ;;  %v514_v10 = vld [vmem:[#allocation6 + $0x208] sm:$0xff]  ;;  %v350_v5 = vadd.f32 %v1171_v1, %v1164_v39  ;;  %v397_v6 = vmax.f32 %v1164_v39, %v1171_v1 }
 0x25a   :  { %v370_v8 = vadd.f32 %v369_v60, %v1148_v57  ;;  %v379_v15 = vadd.f32 %v378_v61, %v1151_v58  ;;  %v417_v24 = vmax.f32 %v416_v18, %v1148_v57  ;;  %v426_v51 = vmax.f32 %v425_v7, %v1151_v58 }
 0x25b   :  { %711 = vmatpush.msra.mxu1 %v520_v23  ;;  %v351_v61 = vadd.f32 %v350_v5, %v1178_v47  ;;  %v360_v62 = vadd.f32 %v359_v53, %v1182_v49  ;;  %v398_v3 = vmax.f32 %v397_v6, %v1178_v47  ;;  %v407_v18 = vmax.f32 %v406_v13, %v1182_v49 }
 0x25c   :  { %v371_v29 = vrot.slane %v370_v8, 4  ;;  %v380_v30 = vrot.slane %v379_v15, 4  ;;  %v418_v41 = vrot.slane %v417_v24, 4  ;;  %v427_v42 = vrot.slane %v426_v51, 4 }
 0x25d   :  { %712 = vmatpush.msra.mxu1 %v518_v32 }
 0x25e   :  { %v372_v48 = vadd.f32 %v371_v29, %v370_v8  ;;  %v381_v9 = vadd.f32 %v380_v30, %v379_v15  ;;  %v419_v54 = vmax.f32 %v417_v24, %v418_v41  ;;  %v428_v55 = vmax.f32 %v426_v51, %v427_v42 }
 0x25f   :  { %713 = vmatpush.msra.mxu1 %v516_v0  ;;  %v389_v51 = vmul.f32 %v1161_v28, %v388_v14 }
 0x260   :  { %v373_v59 = vrot.slane %v372_v48, 2  ;;  %v382_v60 = vrot.slane %v381_v9, 2  ;;  %v420_v8 = vrot.slane %v419_v54, 2  ;;  %v429_v15 = vrot.slane %v428_v55, 2 }
 0x261   :  { %714 = vmatpush.msra.mxu1 %v514_v10  ;;  %v390_v41 = vadd.f32 %v1161_v28, %v389_v51 }
 0x262   :  { %v374_v24 = vadd.f32 %v373_v59, %v372_v48  ;;  %v383_v25 = vadd.f32 %v382_v60, %v381_v9  ;;  %v421_v29 = vmax.f32 %v419_v54, %v420_v8  ;;  %v430_v30 = vmax.f32 %v428_v55, %v429_v15 }
 0x263   :  { %v392_v53 = vsel %vm391_vm13, %v1161_v28, %v390_v41 }
 0x264   :  { %v375_v35 = vrot.slane %v374_v24, 1  ;;  %v384_v42 = vrot.slane %v383_v25, 1  ;;  %v422_v48 = vrot.slane %v421_v29, 1  ;;  %v431_v9 = vrot.slane %v430_v30, 1 }
 0x266   :  { %v376_v5 = vadd.f32 %v375_v35, %v374_v24  ;;  %v385_v54 = vadd.f32 %v384_v42, %v383_v25  ;;  %v423_v14 = vmax.f32 %v421_v29, %v422_v48  ;;  %v432_v59 = vmax.f32 %v430_v30, %v431_v9 }
 0x268   :  { %v308_v63 = vpop.permute.xlu1 %307 }
 0x269   :  { %v1197_v19 = vmul.f32 %v308_v63, %v1059_v20  ;;  %v1200_v7 = vmul.f32 %v308_v63, %v1061_v21 }
 0x26b   :  { %v352_v16 = vadd.f32 %v351_v61, %v1197_v19  ;;  %v361_v17 = vadd.f32 %v360_v62, %v1200_v7  ;;  %v399_v22 = vmax.f32 %v398_v3, %v1197_v19  ;;  %v408_v23 = vmax.f32 %v407_v18, %v1200_v7 }
 0x26c   :  { %v395_v3 = vmul.f32 %v392_v53, %v376_v5  ;;  %v396_v18 = vmul.f32 %v392_v53, %v385_v54 }
 0x26d   :  { %v353_v20 = vrot.slane %v352_v16, 4  ;;  %v362_v26 = vrot.slane %v361_v17, 4  ;;  %v400_v27 = vrot.slane %v399_v22, 4  ;;  %v409_v21 = vrot.slane %v408_v23, 4 }
 0x26f   :  { %v354_v31 = vadd.f32 %v353_v20, %v352_v16  ;;  %v363_v32 = vadd.f32 %v362_v26, %v361_v17  ;;  %v401_v33 = vmax.f32 %v399_v22, %v400_v27  ;;  %v410_v34 = vmax.f32 %v408_v23, %v409_v21 }
 0x270   :  { %v578_v23 = vstv %s1246_s6  ;;  %s828_s6 = sshll.u32 %s966_s4, 4  ;;  %s829_s6 = int_to_ptr.vmem [resolvable:$true] %s828_s6 }
 0x271   :  { %v355_v0 = vrot.slane %v354_v31, 2  ;;  %v364_v45 = vrot.slane %v363_v32, 2  ;;  %v402_v2 = vrot.slane %v401_v33, 2  ;;  %v411_v4 = vrot.slane %v410_v34, 2 }
 0x273   :  { %v403_v11 = vmax.f32 %v401_v33, %v402_v2  ;;  %v412_v10 = vmax.f32 %v410_v34, %v411_v4  ;;  %v356_v12 = vadd.f32 %v355_v0, %v354_v31  ;;  %v365_v38 = vadd.f32 %v364_v45, %v363_v32 }
 0x275   :  { %v404_v55 = vrot.slane %v403_v11, 1  ;;  %v413_v56 = vrot.slane %v412_v10, 1  ;;  %v357_v6 = vrot.slane %v356_v12, 1  ;;  %v366_v13 = vrot.slane %v365_v38, 1 }
 0x277   :  { %v405_v60 = vmax.f32 %v403_v11, %v404_v55  ;;  %v414_v61 = vmax.f32 %v412_v10, %v413_v56  ;;  %v358_v62 = vadd.f32 %v357_v6, %v356_v12  ;;  %v367_v63 = vadd.f32 %v366_v13, %v365_v38 }
 0x279   :  { %v445_v8 = vsel %vm169_vm4, %v423_v14, %v405_v60  ;;  %v446_v15 = vsel %vm169_vm4, %v432_v59, %v414_v61  ;;  %v393_v16 = vmul.f32 %v392_v53, %v358_v62  ;;  %v394_v17 = vmul.f32 %v392_v53, %v367_v63 }
 0x27a   :  { %635 = vmatmul.f32.vlgmr.msrb.gmra.mxu1 %v445_v8  ;;  %655 = vmatmul.f32.vlgmr.msrb.gmra.mxu0 %v446_v15 }
 0x27b   :  { %v437_v28 = vsel %vm169_vm4, %v395_v3, %v393_v16  ;;  %v438_v22 = vsel %vm169_vm4, %v396_v18, %v394_v17 }
 0x27c   :  { %595 = vmatmul.f32.vlgmr.msra.gmra.mxu2 %v437_v28  ;;  %615 = vmatmul.f32.vlgmr.msra.gmra.mxu3 %v438_v22 }
 0x282   :  { %715 = vmatmul.f32.vlgmr.msra.gmra.mxu1 %v445_v8  ;;  %735 = vmatmul.f32.vlgmr.msra.gmra.mxu0 %v446_v15 }
 0x284   :  { %675 = vmatmul.f32.vlgmr.msrb.gmra.mxu2 %v437_v28  ;;  %695 = vmatmul.f32.vlgmr.msrb.gmra.mxu3 %v438_v22 }
 0x2f7   :  { %v636_v20 = vpop.f32.mrf.mxu1  ;;  %v656_v27 = vpop.f32.mrf.mxu0 }
 0x2ff   :  { %v596_v24 = vpop.f32.mrf.mxu2  ;;  %v616_v51 = vpop.f32.mrf.mxu3 }
 0x300   :  { %v597_v25 = vadd.f32 %v596_v24, %v578_v23  ;;  %v716_v35 = vpop.f32.mrf.mxu1  ;;  %v736_v42 = vpop.f32.mrf.mxu0 }
 0x302   :  { %v617_v26 = vadd.f32 %v616_v51, %v597_v25 }
 0x304   :  { %v637_v21 = vadd.f32 %v636_v20, %v617_v26 }
 0x306   :  { %v657_v29 = vadd.f32 %v656_v27, %v637_v21 }
 0x307   :  { %v676_v30 = vpop.f32.mrf.mxu2  ;;  %v696_v33 = vpop.f32.mrf.mxu3 }
 0x308   :  { %v847_v31 = vmul.f32 -1.442695, %v657_v29  ;;  %v677_v32 = vadd.f32 %v676_v30, %v578_v23 }
 0x30a   :  { %874 = vpow2.f32 %v847_v31  ;;  %v697_v34 = vadd.f32 %v696_v33, %v677_v32 }
 0x30c   :  { %v717_v41 = vadd.f32 %v716_v35, %v697_v34 }
 0x30e   :  { %v737_v0 = vadd.f32 %v736_v42, %v717_v41 }
 0x310   :  { %v875_v45 = vpop.eup %874  ;;  %v848_v2 = vmul.f32 -1.442695, %v737_v0 }
 0x311   :  { %v745_v4 = vadd.f32 1.0, %v875_v45 }
 0x312   :  { %876 = vpow2.f32 %v848_v2 }
 0x313   :  { %878 = vrcp.f32 %v745_v4  ;;  %vm752_vm0 = vweird.f32 %v745_v4  ;;  %v758_v14 = vand.u32 2147483648, %v745_v4  ;;  %v756_v59 = vand.u32 2147483647, %v745_v4 }
 0x315   :  { %v759_v3 = vor.u32 1.1754944e-38, %v758_v14  ;;  %vm757_vm7 = vcmp.eq.f32.partialorder %v756_v59, 8.507059e+37 }
 0x318   :  { %v877_v48 = vpop.eup %876 }
 0x319   :  { %v879_v9 = vpop.eup %878  ;;  %v746_v11 = vadd.f32 1.0, %v877_v48 }
 0x31a   :  { %v748_v10 = vmul.f32 %v879_v9, %v745_v4  ;;  %vm753_vm14 = vweird.f32 %v879_v9 }
 0x31b   :  { %880 = vrcp.f32 %v746_v11  ;;  %v773_v55 = vand.u32 2147483648, %v746_v11  ;;  %v771_v13 = vand.u32 2147483647, %v746_v11  ;;  %vm754_vm1 = vmor %vm752_vm0, %vm753_vm14  ;;  %vm767_vm2 = vweird.f32 %v746_v11 }
 0x31c   :  { %v749_v12 = vsub.f32 1.0, %v748_v10 }
 0x31d   :  { %v774_v61 = vor.u32 1.1754944e-38, %v773_v55  ;;  %vm772_vm5 = vcmp.eq.f32.partialorder %v771_v13, 8.507059e+37 }
 0x31e   :  { %v750_v5 = vmul.f32 %v879_v9, %v749_v12 }
 0x320   :  { %v751_v56 = vadd.f32 %v879_v9, %v750_v5 }
 0x321   :  { %v881_v38 = vpop.eup %880 }
 0x322   :  { %v763_v53 = vmul.f32 %v881_v38, %v746_v11  ;;  %vm768_vm15 = vweird.f32 %v881_v38  ;;  %v755_v62 = vsel %vm754_vm1, %v879_v9, %v751_v56 }
 0x323   :  { %vm769_vm3 = vmor %vm767_vm2, %vm768_vm15  ;;  %v760_v15 = vsel %vm757_vm7, %v759_v3, %v755_v62 }
 0x324   :  { %v764_v54 = vsub.f32 1.0, %v763_v53 }
 0x326   :  { %v765_v6 = vmul.f32 %v881_v38, %v764_v54 }
 0x328   :  { %v766_v60 = vadd.f32 %v881_v38, %v765_v6 }
 0x32a   :  { %v770_v63 = vsel %vm769_vm3, %v881_v38, %v766_v60 }
 0x32b   :  { %v775_v18 = vsel %vm772_vm5, %v774_v61, %v770_v63 }
 0x32c   :  { %v779_v8 = vrot.slane %v775_v18, 7 }
 0x32e   :  { %v781_v16 = vsel %vm780_vm6, %v760_v15, %v779_v8  ;;  %v782_v17 = vsel %vm169_vm4, %v760_v15, %v779_v8 }
 0x32f   :  { %v783_v28 = vrot.slane %v782_v17, 1  ;;  %v784_v22 = vperm.slane %v781_v16, 0  ;;  %v785_v23 = vperm.slane %v781_v16, 1 }
 0x331   :  { %v792_v24 = vmul.f32 %v784_v22, %v1164_v39  ;;  %v793_v51 = vmul.f32 %v785_v23, %v1167_v40  ;;  %v794_v25 = vmul.f32 %v784_v22, %v1171_v1  ;;  %v795_v20 = vmul.f32 %v785_v23, %v1175_v46 }
 0x332   :  { %v786_v26 = vperm.slane %v783_v28, 0  ;;  %v796_v27 = vmul.f32 %v784_v22, %v1178_v47  ;;  %v787_v21 = vperm.slane %v783_v28, 1  ;;  %v797_v29 = vmul.f32 %v785_v23, %v1182_v49 }
 0x333   :  { %808 = vst [vmem:[#allocation8] sm:$0xff] %v792_v24  ;;  %v798_v30 = vmul.f32 %v784_v22, %v1197_v19  ;;  %v799_v31 = vmul.f32 %v785_v23, %v1200_v7 }
 0x334   :  { %809 = vst [vmem:[#allocation8 + $0x8] sm:$0xff] %v793_v51  ;;  %v800_v39 = vmul.f32 %v786_v26, %v1122_v36  ;;  %v801_v40 = vmul.f32 %v787_v21, %v1125_v37  ;;  %v802_v1 = vmul.f32 %v786_v26, %v1128_v43  ;;  %v803_v46 = vmul.f32 %v787_v21, %v1131_v44 }
 0x335   :  { %810 = vst [vmem:[#allocation8 + $0x10] sm:$0xff] %v794_v25  ;;  %v804_v47 = vmul.f32 %v786_v26, %v1140_v50  ;;  %v805_v49 = vmul.f32 %v787_v21, %v1143_v52  ;;  %v806_v19 = vmul.f32 %v786_v26, %v1148_v57  ;;  %v807_v36 = vmul.f32 %v787_v21, %v1151_v58 }
 0x336   :  { %811 = vst [vmem:[#allocation8 + $0x18] sm:$0xff] %v795_v20 }
 0x337   :  { %812 = vst [vmem:[#allocation8 + $0x20] sm:$0xff] %v796_v27 }
 0x338   :  { %813 = vst [vmem:[#allocation8 + $0x28] sm:$0xff] %v797_v29 }
 0x339   :  { %814 = vst [vmem:[#allocation8 + $0x30] sm:$0xff] %v798_v30 }
 0x33a   :  { %815 = vst [vmem:[#allocation8 + $0x38] sm:$0xff] %v799_v31 }
 0x33b   :  { %816 = vst [vmem:[#allocation8 + $0x40] sm:$0xff] %v800_v39 }
 0x33c   :  { %817 = vst [vmem:[#allocation8 + $0x48] sm:$0xff] %v801_v40 }
 0x33d   :  { %818 = vst [vmem:[#allocation8 + $0x50] sm:$0xff] %v802_v1 }
 0x33e   :  { %819 = vst [vmem:[#allocation8 + $0x58] sm:$0xff] %v803_v46 }
 0x33f   :  { %820 = vst [vmem:[#allocation8 + $0x60] sm:$0xff] %v804_v47 }
 0x340   :  { %821 = vst [vmem:[#allocation8 + $0x68] sm:$0xff] %v805_v49 }
 0x341   :  { %822 = vst [vmem:[#allocation8 + $0x70] sm:$0xff] %v806_v19 }
 0x342   :  { %823 = vst [vmem:[#allocation8 + $0x78] sm:$0xff] %v807_v36 }
 0x343   :  { %836 = dma.vmem_to_hbm [thread:$0]  %s829_s6, 2048, %s831_s26, [#allocation5], %s961_s9, %s961_s9, %s962_s10  }
 0x344   :  { %958 = dma.done.wait [#allocation5], 2048  }
 0x345   :  { %959 = vsyncadd [#allocation5], 4294965248 }
 0x346   :  { %841 = vsyncpa [#allocation4], 1 }
 0x347   :  { %842 = vsyncpa [#allocation7], 1 }
 0x348   :  { %843 = vsyncpa [#allocation5], 1 }

</bundles_post_ra>
